<compile_context>
chip_gen: v5e
topology: v5e:2x2
jax: 0.10.0
libtpu: 0.0.40
codegen_flags: <defaults>
</compile_context>

<pallas_src>
import jax
import jax.numpy as jnp
from jax.experimental import pallas as pl
from jax.experimental.pallas import tpu as pltpu
from typing import NamedTuple

_LANE = 128
_SUBLANE = 8


class ActorParams(NamedTuple):
    """Kernel-ready parameters.  Build once with `prepare_actor_params`."""
    w1: jax.Array   # (state_dim, 256) bf16
    b1: jax.Array   # (1, 256) f32
    w2: jax.Array   # (256, a_pad) bf16, zero-padded to a multiple of 128 cols
    b2: jax.Array   # (1, action_dim) f32


def prepare_actor_params(w1, b1, w2, b2):
    """Hoisted parameter prep: call once per parameter update, reuse across steps.

    w1: (state_dim, 256), b1: (256,), w2: (256, action_dim), b2: (action_dim,)
    (weights already transposed vs. the torch nn.Linear layout).
    """
    hidden = w1.shape[1]
    action_dim = w2.shape[1]
    a_pad = ((action_dim + _LANE - 1) // _LANE) * _LANE
    w1b = w1.astype(jnp.bfloat16)
    w2b = jnp.zeros((hidden, a_pad), jnp.bfloat16).at[:, :action_dim].set(
        w2.astype(jnp.bfloat16))
    b1r = b1.reshape(1, hidden).astype(jnp.float32)
    b2r = b2.reshape(1, action_dim).astype(jnp.float32)
    return ActorParams(w1=w1b, b1=b1r, w2=w2b, b2=b2r)


def _actor_kernel(scal_ref, x_ref, w1_ref, b1_ref, w2_ref, b2_ref, o_ref):
    # Affine rescale parameters held in SMEM.
    mid = scal_ref[0, 0]
    half = scal_ref[0, 1]

    # Cast the state to bf16 in-kernel (no separate XLA cast op per call).
    x = x_ref[...].astype(jnp.bfloat16)

    # Layer 1: Linear(state_dim, 256) + ReLU.  bf16 MXU operands, f32 acc.
    h = jnp.dot(x, w1_ref[...], preferred_element_type=jnp.float32)
    h = jnp.maximum(h + b1_ref[...], 0.0).astype(jnp.bfloat16)

    # Layer 2: Linear(256, action_dim) on the lane-padded weight, then slice
    # down to the real action columns before the epilogue / store so only
    # real bytes are written to HBM.
    y = jnp.dot(h, w2_ref[...], preferred_element_type=jnp.float32)
    a_dim = o_ref.shape[-1]
    y = y[:, :a_dim] + b2_ref[...]

    # Single EUP tanh + one VPU FMA epilogue, narrow f32 store.
    o_ref[...] = (mid + half * jnp.tanh(y)).astype(o_ref.dtype)


def _cdiv(a, b):
    return -(-a // b)


def _choose_batch_tiling(B, block_b):
    """Pick (tile_rows, padded_B, num_blocks) with minimal row padding.

    - rows padded only up to the next multiple of 8 (sublane alignment),
    - >=2 blocks once B >= 512 so v7x's two TensorCores both get work.
    """
    B8 = ((B + _SUBLANE - 1) // _SUBLANE) * _SUBLANE
    if B8 <= block_b and B8 < 512:
        return B8, B8, 1
    n = max(_cdiv(B8, block_b), 2)
    tb = ((_cdiv(B8, n) + _SUBLANE - 1) // _SUBLANE) * _SUBLANE
    return tb, n * tb, n


def actor_forward(state, params: ActorParams, *, max_action, min_action,
                  block_b=512):
    """Pallas implementation of Actor.forward.

    state:  (B, state_dim) f32
    params: ActorParams from prepare_actor_params (cache across calls!)
    returns: (B, action_dim) f32
    """
    B, state_dim = state.shape
    hidden = params.w1.shape[1]
    a_pad = params.w2.shape[1]
    action_dim = params.b2.shape[1]

    # Rescale scalars -> SMEM (stays traced if max/min are traced values).
    mid = (max_action + min_action) * 0.5
    half = (max_action - min_action) * 0.5
    scal = jnp.stack([jnp.asarray(mid, jnp.float32),
                      jnp.asarray(half, jnp.float32)]).reshape(1, 2)

    # Adaptive batch tiling (tiny or zero row padding).
    tb, padded_B, nblk = _choose_batch_tiling(B, block_b)
    x = state
    if padded_B != B:
        x = jnp.zeros((padded_B, state_dim), state.dtype).at[:B].set(state)

    out = pl.pallas_call(
        _actor_kernel,
        out_shape=jax.ShapeDtypeStruct((padded_B, action_dim), jnp.float32),
        grid_spec=pltpu.PrefetchScalarGridSpec(
            num_scalar_prefetch=0,
            grid=(nblk,),
            in_specs=[
                # (mid, half_range) scalars -> SMEM
                pl.BlockSpec((1, 2), lambda i: (0, 0),
                             memory_space=pltpu.MemorySpace.SMEM),
                # batch tile of the state (f32; cast to bf16 inside the kernel)
                pl.BlockSpec((tb, state_dim), lambda i: (i, 0)),
                # weights / biases: constant index_map -> VMEM-resident
                pl.BlockSpec((state_dim, hidden), lambda i: (0, 0)),
                pl.BlockSpec((1, hidden), lambda i: (0, 0)),
                pl.BlockSpec((hidden, a_pad), lambda i: (0, 0)),
                pl.BlockSpec((1, action_dim), lambda i: (0, 0)),
            ],
            out_specs=pl.BlockSpec((tb, action_dim), lambda i: (i, 0)),
        ),
        compiler_params=pltpu.CompilerParams(
            dimension_semantics=("parallel",),   # batch tiles shard across TCs
        ),
    )(scal, x, params.w1, params.b1, params.w2, params.b2)

    return out if padded_B == B else out[:B]


def _reference_f32(state, w1, b1, w2, b2, max_action, min_action):
    h = jnp.maximum(state @ w1 + b1, 0.0)
    y = h @ w2 + b2
    return (max_action + min_action) / 2.0 + (max_action - min_action) / 2.0 * jnp.tanh(y)


if __name__ == "__main__":
    key = jax.random.PRNGKey(0)
    k_state, k_w1, k_b1, k_w2, k_b2, k_big = jax.random.split(key, 6)

    batch = 2
    state_dim = 16
    hidden = 256          # fixed by the module definition
    action_dim = 8
    max_action = 2.0
    min_action = -1.0

    state = jax.random.normal(k_state, (batch, state_dim), dtype=jnp.float32)

    # Deterministic parameter init (mimics nn.Linear uniform fan-in scaling).
    bound1 = 1.0 / (state_dim ** 0.5)
    w1 = jax.random.uniform(k_w1, (state_dim, hidden), jnp.float32, -bound1, bound1)
    b1 = jax.random.uniform(k_b1, (hidden,), jnp.float32, -bound1, bound1)

    bound2 = 1.0 / (hidden ** 0.5)
    w2 = jax.random.uniform(k_w2, (hidden, action_dim), jnp.float32, -bound2, bound2)
    b2 = jax.random.uniform(k_b2, (action_dim,), jnp.float32, -bound2, bound2)

    # Hoisted prep: done once, reused for every forward call below.
    params = prepare_actor_params(w1, b1, w2, b2)
    params = jax.tree_util.tree_map(jax.block_until_ready, params)

    # Small-batch path (single 8-row block, batch padded 2 -> 8).
    out = actor_forward(state, params, max_action=max_action, min_action=min_action)
    out = jax.block_until_ready(out)
    ref = _reference_f32(state, w1, b1, w2, b2, max_action, min_action)
    assert out.shape == (batch, action_dim)
    # bf16 MXU operands -> compare to the f32 reference with a bf16-level tolerance.
    assert jnp.allclose(out, ref, atol=2e-2, rtol=2e-2), "mismatch vs f32 reference (small batch)"

    # Large-batch path: two 320-row parallel tiles, zero padding waste.
    big_batch = 640
    big_state = jax.random.normal(k_big, (big_batch, state_dim), dtype=jnp.float32)
    out_big = actor_forward(big_state, params, max_action=max_action, min_action=min_action)
    out_big = jax.block_until_ready(out_big)
    ref_big = _reference_f32(big_state, w1, b1, w2, b2, max_action, min_action)
    assert out_big.shape == (big_batch, action_dim)
    assert jnp.allclose(out_big, ref_big, atol=2e-2, rtol=2e-2), "mismatch vs f32 reference (big batch)"

    print("KERNEL_OK")
</pallas_src>

<mosaic_0001>
module attributes {stable_mosaic.version = 11 : i64} {
  func.func @_actor_kernel(%arg0: i32, %arg1: memref<1x2xf32, #tpu.memory_space<smem>>, %arg2: memref<8x16xf32, #tpu.memory_space<vmem>>, %arg3: memref<16x256xbf16, #tpu.memory_space<vmem>>, %arg4: memref<1x256xf32, #tpu.memory_space<vmem>>, %arg5: memref<256x128xbf16, #tpu.memory_space<vmem>>, %arg6: memref<1x8xf32, #tpu.memory_space<vmem>>, %arg7: memref<8x8xf32, #tpu.memory_space<vmem>>) attributes {dimension_semantics = [#tpu.dimension_semantics<parallel>], iteration_bounds = array<i64: 1>, scalar_prefetch = 0 : i64, scratch_operands = 0 : i64, tpu.core_type = #tpu.core_type<tc>, window_params = [{transform_indices = @transform_0, window_bounds = array<i64: 1, 2>}, {transform_indices = @transform_1, window_bounds = array<i64: 8, 16>}, {pipeline_mode = #tpu.pipeline_mode<synchronous>, transform_indices = @transform_2, window_bounds = array<i64: 16, 256>}, {pipeline_mode = #tpu.pipeline_mode<synchronous>, transform_indices = @transform_3, window_bounds = array<i64: 1, 256>}, {pipeline_mode = #tpu.pipeline_mode<synchronous>, transform_indices = @transform_4, window_bounds = array<i64: 256, 128>}, {pipeline_mode = #tpu.pipeline_mode<synchronous>, transform_indices = @transform_5, window_bounds = array<i64: 1, 8>}, {transform_indices = @transform_6, window_bounds = array<i64: 8, 8>}]} {
    %c0 = arith.constant 0 : index
    %c0_0 = arith.constant 0 : index
    %0 = memref.load %arg1[%c0, %c0_0] : memref<1x2xf32, #tpu.memory_space<smem>>
    %c0_1 = arith.constant 0 : index
    %c1 = arith.constant 1 : index
    %1 = memref.load %arg1[%c0_1, %c1] : memref<1x2xf32, #tpu.memory_space<smem>>
    %c0_2 = arith.constant 0 : index
    %c0_3 = arith.constant 0 : index
    %2 = vector.load %arg2[%c0_2, %c0_3] : memref<8x16xf32, #tpu.memory_space<vmem>>, vector<8x16xf32>
    %3 = arith.truncf %2 : vector<8x16xf32> to vector<8x16xbf16>
    %c0_4 = arith.constant 0 : index
    %c0_5 = arith.constant 0 : index
    %4 = vector.load %arg3[%c0_4, %c0_5] : memref<16x256xbf16, #tpu.memory_space<vmem>>, vector<16x256xbf16>
    %cst = arith.constant dense<0.000000e+00> : vector<8x256xf32>
    %5 = tpu.matmul %3, %4, %cst {dimension_numbers = #tpu.dot_dimension_numbers<[1], [0], [0], [1], [0, 0, 1, 1], [], []>} : vector<8x16xbf16>, vector<16x256xbf16>, vector<8x256xf32> -> vector<8x256xf32>
    %c0_6 = arith.constant 0 : index
    %c0_7 = arith.constant 0 : index
    %6 = vector.load %arg4[%c0_6, %c0_7] : memref<1x256xf32, #tpu.memory_space<vmem>>, vector<1x256xf32>
    %7 = vector.broadcast %6 : vector<1x256xf32> to vector<8x256xf32>
    %8 = arith.addf %5, %7 : vector<8x256xf32>
    %cst_8 = arith.constant 0.000000e+00 : f32
    %9 = vector.broadcast %cst_8 : f32 to vector<8x256xf32>
    %10 = arith.maximumf %8, %9 : vector<8x256xf32>
    %11 = arith.truncf %10 : vector<8x256xf32> to vector<8x256xbf16>
    %c0_9 = arith.constant 0 : index
    %c0_10 = arith.constant 0 : index
    %12 = vector.load %arg5[%c0_9, %c0_10] : memref<256x128xbf16, #tpu.memory_space<vmem>>, vector<256x128xbf16>
    %cst_11 = arith.constant dense<0.000000e+00> : vector<8x128xf32>
    %13 = tpu.matmul %11, %12, %cst_11 {dimension_numbers = #tpu.dot_dimension_numbers<[1], [0], [0], [1], [0, 0, 1, 1], [], []>} : vector<8x256xbf16>, vector<256x128xbf16>, vector<8x128xf32> -> vector<8x128xf32>
    %14 = vector.extract_strided_slice %13 {offsets = [0, 0], sizes = [8, 8], strides = [1, 1]} : vector<8x128xf32> to vector<8x8xf32>
    %c0_12 = arith.constant 0 : index
    %c0_13 = arith.constant 0 : index
    %15 = vector.load %arg6[%c0_12, %c0_13] : memref<1x8xf32, #tpu.memory_space<vmem>>, vector<1x8xf32>
    %16 = vector.broadcast %15 : vector<1x8xf32> to vector<8x8xf32>
    %17 = arith.addf %14, %16 : vector<8x8xf32>
    %18 = math.tanh %17 : vector<8x8xf32>
    %19 = vector.broadcast %1 : f32 to vector<8x8xf32>
    %20 = arith.mulf %19, %18 : vector<8x8xf32>
    %21 = vector.broadcast %0 : f32 to vector<8x8xf32>
    %22 = arith.addf %21, %20 : vector<8x8xf32>
    %c0_14 = arith.constant 0 : index
    %c0_15 = arith.constant 0 : index
    %23 = vector.load %arg7[%c0_14, %c0_15] : memref<8x8xf32, #tpu.memory_space<vmem>>, vector<8x8xf32>
    tpu.vector_store %arg7[%c0_14, %c0_15], %22 {strides = array<i32>} : memref<8x8xf32, #tpu.memory_space<vmem>>, vector<8x8xf32>,
    return
  }
  func.func @transform_0(%arg0: i32) -> (i32, i32) {
    %c0_i32 = arith.constant 0 : i32
    %c0_i32_0 = arith.constant 0 : i32
    %c0_i32_1 = arith.constant 0 : i32
    return %c0_i32, %c0_i32_0 : i32, i32
  }
  func.func @transform_1(%arg0: i32) -> (i32, i32) {
    %c0_i32 = arith.constant 0 : i32
    %c0_i32_0 = arith.constant 0 : i32
    return %arg0, %c0_i32 : i32, i32
  }
  func.func @transform_2(%arg0: i32) -> (i32, i32) {
    %c0_i32 = arith.constant 0 : i32
    %c0_i32_0 = arith.constant 0 : i32
    %c0_i32_1 = arith.constant 0 : i32
    return %c0_i32, %c0_i32_0 : i32, i32
  }
  func.func @transform_3(%arg0: i32) -> (i32, i32) {
    %c0_i32 = arith.constant 0 : i32
    %c0_i32_0 = arith.constant 0 : i32
    %c0_i32_1 = arith.constant 0 : i32
    return %c0_i32, %c0_i32_0 : i32, i32
  }
  func.func @transform_4(%arg0: i32) -> (i32, i32) {
    %c0_i32 = arith.constant 0 : i32
    %c0_i32_0 = arith.constant 0 : i32
    %c0_i32_1 = arith.constant 0 : i32
    return %c0_i32, %c0_i32_0 : i32, i32
  }
  func.func @transform_5(%arg0: i32) -> (i32, i32) {
    %c0_i32 = arith.constant 0 : i32
    %c0_i32_0 = arith.constant 0 : i32
    %c0_i32_1 = arith.constant 0 : i32
    return %c0_i32, %c0_i32_0 : i32, i32
  }
  func.func @transform_6(%arg0: i32) -> (i32, i32) {
    %c0_i32 = arith.constant 0 : i32
    %c0_i32_0 = arith.constant 0 : i32
    return %arg0, %c0_i32 : i32, i32
  }
}

</mosaic_0001>

<bundles_post_ra>
// kernel: tpu_custom_call.1
= control target key start
LH: loop header
LB: loop body
LE: loop exit
PB: predicated region body
PF: predicated region fallthrough
CT: control target
= control target key end

     0   :  { %11 = vsyncpa [#allocation5], 0  ;;  %s610_s0 = inlined_call_operand.hbm [shape: f32[1,2], index: 0, kind: input, shape index: {}]   ;;  %s611_s1 = inlined_call_operand.hbm [shape: f32[8,16], index: 1, kind: input, shape index: {}]   ;;  %s612_s2 = inlined_call_operand.hbm [shape: bf16[16,256], index: 2, kind: input, shape index: {}]   ;;  %s613_s3 = inlined_call_operand.vmem [shape: f32[1,256], index: 3, kind: input, shape index: {}]   ;;  %s614_s4 = inlined_call_operand.hbm [shape: bf16[256,128], index: 4, kind: input, shape index: {}]   ;;  %s615_s5 = inlined_call_operand.vmem [shape: f32[1,8], index: 5, kind: input, shape index: {}]   ;;  %s616_s6 = inlined_call_operand.hbm [shape: f32[8,8], index: 6, kind: output, shape index: {}]  }
   0x1   :  { %12 = vsyncpa [#allocation3], 0 }
   0x2   :  { %13 = vsyncpa [#allocation8], 0  ;;  %s39_s23 = sshll.u32 %s612_s2, 4  ;;  %s40_s23 = int_to_ptr.hbm [resolvable:$true] %s39_s23 }
   0x3   :  { %14 = vsyncpa [#allocation4], 0  ;;  %s545_s24 = smov [#allocation7]   ;;  %s20_s28 = sshll.u32 %s610_s0, 4  ;;  %s21_s28 = int_to_ptr.hbm [resolvable:$true] %s20_s28 }
   0x4   :  { %s41_s25 = sshll.u32 %s545_s24, 4  ;;  %s546_s29 = smov 128   ;;  %s42_s25 = int_to_ptr.vmem [resolvable:$true] %s41_s25 }
   0x5   :  { %s547_s30 = smov 8   ;;  %s548_s7 = smov [#allocation2]  }
   0x6   :  { %47 = dma.hbm_to_vmem [thread:$0]  %s40_s23, 256, %s42_s25, [#allocation8], %s546_s29, %s546_s29, %s547_s30  }
   0x7   :  { %23 = dma.hbm_to_smem %s21_s28, 16, %s548_s7, [#allocation5]  }
   0x8   :  { %s29_s10 = sshll.u32 %s611_s1, 4  ;;  %s549_s2 = smov [#allocation6]   ;;  %s30_s10 = int_to_ptr.hbm [resolvable:$true] %s29_s10 }
   0x9   :  { %s31_s11 = sshll.u32 %s549_s2, 4  ;;  %s54_s14 = sshll.u32 %s614_s4, 4  ;;  %s32_s11 = int_to_ptr.vmem [resolvable:$true] %s31_s11  ;;  %s55_s14 = int_to_ptr.hbm [resolvable:$true] %s54_s14 }
   0xa   :  { %34 = dma.hbm_to_vmem [thread:$0]  %s30_s10, 128, %s32_s11, [#allocation3]  }
   0xb   :  { %s550_s0 = smov [#allocation9]   ;;  %s551_s16 = smov 64  }
   0xc   :  { %s56_s15 = sshll.u32 %s550_s0, 4  ;;  %s552_s17 = smov 4   ;;  %s57_s15 = int_to_ptr.vmem [resolvable:$true] %s56_s15 }
   0xd   :  { %62 = dma.hbm_to_vmem [thread:$0]  %s55_s14, 2048, %s57_s15, [#allocation8], %s551_s16, %s551_s16, %s552_s17  }
   0xe   :  { %537 = dma.done.wait [#allocation5], 16  }
   0xf   :  { %538 = vsyncadd [#allocation5], 4294967280 }
  0x10   :  { %539 = dma.done.wait [#allocation3], 128  }
  0x11   :  { %540 = vsyncadd [#allocation3], 4294967168 }
  0x12   :  { %541 = dma.done.wait [#allocation8], 2304  }
  0x13   :  { %542 = vsyncadd [#allocation8], 4294964992 }
  0x14   :  { %81 = sfence }
  0x15   :  { %v327_v0 = vld [vmem:[#allocation7] sm:$0xf]  ;;  %v400_v1 = vld [vmem:[#allocation7 + $0x4] sm:$0xf0]  ;;  %v399_v2 = vld [vmem:[#allocation7 + $0x4] sm:$0xf] }
  0x16   :  { %v328_v3 = vor.u32 %v400_v1, %v327_v0  ;;  %v329_v4 = vld [vmem:[#allocation7 + $0x8] sm:$0xf0]  ;;  %v85_v5 = vld [vmem:[#allocation6] sm:$0xff]  ;;  %vm105_vm0 = vcmask 130048   ;;  %v407_v10 = vld [vmem:[#allocation9 + $0x30] sm:$0xff]  ;;  %s83_s20 = sld [smem:[#allocation2]] }
  0x17   :  { %v408_v6 = vld [vmem:[#allocation9 + $0x38] sm:$0xff]  ;;  %v332_v7 = vor.u32 %v399_v2, %v329_v4  ;;  %v86_v8 = vpack.c.bf16 %v85_v5, %v85_v5  ;;  %v415_v11 = vld [vmem:[#allocation9 + $0x70] sm:$0xff]  ;;  %v406_v12 = vld [vmem:[#allocation9 + $0x28] sm:$0xff]  ;;  %s553_s21 = smov [#allocation10]   ;;  %s312_s25 = sshll.u32 %s616_s6, 4  ;;  %vm303_vm1 = vcmask 64512   ;;  %s313_s25 = int_to_ptr.hbm [resolvable:$true] %s312_s25 }
  0x18   :  { %v416_v9 = vld [vmem:[#allocation9 + $0x78] sm:$0xff]  ;;  %116 = vmatpush.bf16.msra.mxu0 %v328_v3  ;;  %267 = vmatpush.bf16.msra.mxu2 %v408_v6  ;;  %v414_v13 = vld [vmem:[#allocation9 + $0x68] sm:$0xff]  ;;  %v405_v14 = vld [vmem:[#allocation9 + $0x20] sm:$0xff]  ;;  %s310_s22 = sshll.u32 %s553_s21, 4  ;;  %s311_s22 = int_to_ptr.vmem [resolvable:$true] %s310_s22 }
  0x19   :  { %129 = vmatpush.bf16.msra.mxu1 %v332_v7  ;;  %280 = vmatpush.bf16.msra.mxu3 %v416_v9  ;;  %v413_v15 = vld [vmem:[#allocation9 + $0x60] sm:$0xff]  ;;  %v404_v16 = vld [vmem:[#allocation9 + $0x18] sm:$0xff]  ;;  %v403_v18 = vld [vmem:[#allocation9 + $0x10] sm:$0xff] }
  0x1a   :  { %v412_v17 = vld [vmem:[#allocation9 + $0x58] sm:$0xff]  ;;  %v411_v19 = vld [vmem:[#allocation9 + $0x50] sm:$0xff]  ;;  %v402_v20 = vld [vmem:[#allocation9 + $0x8] sm:$0xff] }
  0x1b   :  { %333 = vmatmul.msk.bf16.vlgmr.msra.gmra.mxu0 %vm105_vm0, %v86_v8  ;;  %v410_v21 = vld [vmem:[#allocation9 + $0x48] sm:$0xff]  ;;  %v401_v22 = vld [vmem:[#allocation9] sm:$0xff] }
  0x1c   :  { %334 = vmatmul.msk.bf16.vlgmr.msra.gmra.mxu1 %vm105_vm0, %v86_v8  ;;  %268 = vmatpush.bf16.msra.mxu2 %v407_v10  ;;  %v409_v23 = vld [vmem:[#allocation9 + $0x40] sm:$0xff]  ;;  %v89_v24 = vld [vmem:[%s613_s3] sm:$0x3]  ;;  %s324_s3 = sld [smem:[#allocation2 + $0x1]]  ;;  %v301_v46 = vstv %s83_s20 }
  0x1d   :  { %281 = vmatpush.bf16.msra.mxu3 %v415_v11  ;;  %v91_v25 = vperm.slane %v89_v24, 0  ;;  %v92_v26 = vperm.slane %v89_v24, 1  ;;  %v426_v38 = vld [vmem:[%s615_s5] ss:$0 sm:$0xff] }
  0x20   :  { %269 = vmatpush.bf16.msra.mxu2 %v406_v12 }
  0x21   :  { %282 = vmatpush.bf16.msra.mxu3 %v414_v13 }
  0x22   :  { %v299_v44 = vstv %s324_s3 }
  0x24   :  { %270 = vmatpush.bf16.msra.mxu2 %v405_v14 }
  0x25   :  { %283 = vmatpush.bf16.msra.mxu3 %v413_v15 }
  0x28   :  { %271 = vmatpush.bf16.msra.mxu2 %v404_v16 }
  0x29   :  { %284 = vmatpush.bf16.msra.mxu3 %v412_v17 }
  0x2c   :  { %272 = vmatpush.bf16.msra.mxu2 %v403_v18 }
  0x2d   :  { %285 = vmatpush.bf16.msra.mxu3 %v411_v19 }
  0x30   :  { %273 = vmatpush.bf16.msra.mxu2 %v402_v20 }
  0x31   :  { %286 = vmatpush.bf16.msra.mxu3 %v410_v21 }
  0x34   :  { %274 = vmatpush.bf16.msra.mxu2 %v401_v22 }
  0x35   :  { %287 = vmatpush.bf16.msra.mxu3 %v409_v23 }
  0x98   :  { %v118_v27 = vpop.f32.mrf.mxu0 }
  0x99   :  { %v119_v28 = vadd.f32 %v118_v27, %v91_v25  ;;  %v131_v29 = vpop.f32.mrf.mxu1 }
  0x9a   :  { %v132_v30 = vadd.f32 %v131_v29, %v92_v26 }
  0x9b   :  { %v135_v31 = vmax.f32 %v119_v28, 0.0 }
  0x9c   :  { %v136_v32 = vmax.f32 %v132_v30, 0.0 }
  0x9d   :  { %v137_v33 = vpack.c.bf16 %v135_v31, %v135_v31 }
  0x9e   :  { %v138_v34 = vpack.c.bf16 %v136_v32, %v136_v32 }
  0x9f   :  { %275 = vmatmul.bf16.vlgmr.msra.gmra.mxu2 %v137_v33 }
  0xa0   :  { %288 = vmatmul.bf16.vlgmr.msra.gmra.mxu3 %v138_v34  ;;  %v120_v35 = vpop.f32.mrf.mxu0 }
  0xa1   :  { %v133_v36 = vpop.f32.mrf.mxu1 }
 0x122   :  { %v276_v37 = vpop.f32.mrf.mxu2 }
 0x123   :  { %v289_v39 = vpop.f32.mrf.mxu3 }
 0x124   :  { %v290_v40 = vadd.f32 %v289_v39, %v276_v37 }
 0x126   :  { %v297_v41 = vadd.f32 %v426_v38, %v290_v40 }
 0x128   :  { %427 = vtanh.f32 %v297_v41 }
 0x12a   :  { %v278_v42 = vpop.f32.mrf.mxu2 }
 0x12b   :  { %v291_v43 = vpop.f32.mrf.mxu3 }
 0x12e   :  { %v428_v45 = vpop.eup %427 }
 0x12f   :  { %v300_v47 = vmul.f32 %v428_v45, %v299_v44 }
 0x131   :  { %v302_v48 = vadd.f32 %v301_v46, %v300_v47 }
 0x133   :  { %304 = vst.msk [vmem:[#allocation10] sm:$0xff] %vm303_vm1, %v302_v48 }
 0x134   :  { %315 = dma.vmem_to_hbm [thread:$0]  %s311_s22, 128, %s313_s25, [#allocation4]  }
 0x135   :  { %543 = dma.done.wait [#allocation4], 128  }
 0x136   :  { %544 = vsyncadd [#allocation4], 4294967168 }
 0x137   :  { %320 = vsyncpa [#allocation3], 1 }
 0x138   :  { %321 = vsyncpa [#allocation8], 1 }
 0x139   :  { %322 = vsyncpa [#allocation4], 1 }
 0x13a   :  { %323 = vsyncpa [#allocation5], 1 }

</bundles_post_ra>
